<compile_context>
chip_gen: v5e
topology: v5e:2x2
jax: 0.10.0
libtpu: 0.0.40
codegen_flags: <defaults>
</compile_context>

<pallas_src>
import functools
import math

import jax
import jax.numpy as jnp
from jax import lax
from jax.experimental import pallas as pl
from jax.experimental.pallas import tpu as pltpu


_VMEM_LIMIT_BYTES = 40 * 1024 * 1024     # safe on v5e / v6e / v7x (64 MiB phys)
_TARGET_TILE_BYTES = 2 * 1024 * 1024     # per-tile; x4 with in/out double-buffers


def _ln_channels_first_kernel(x_ref, w_ref, b_ref, o_ref, *, eps):
    """Normalize over the channel (sublane) axis of a (C, TILE_S) tile."""
    x = x_ref[...].astype(jnp.float32)
    mean = jnp.mean(x, axis=0, keepdims=True)           # (1, TILE_S) sublane reduce
    xc = x - mean
    var = jnp.mean(xc * xc, axis=0, keepdims=True)      # biased variance
    inv = lax.rsqrt(var + eps)
    y = xc * inv * w_ref[...] + b_ref[...]               # w/b: (C, 1) float32
    o_ref[...] = y.astype(o_ref.dtype)


def _ln_rows_kernel(x_ref, w_ref, b_ref, o_ref, *, eps):
    """Normalize over the last (lane) axis of a (TILE_M, C) tile."""
    x = x_ref[...].astype(jnp.float32)
    mean = jnp.mean(x, axis=-1, keepdims=True)
    xc = x - mean
    var = jnp.mean(xc * xc, axis=-1, keepdims=True)      # biased variance
    inv = lax.rsqrt(var + eps)
    y = xc * inv * w_ref[...] + b_ref[...]               # w/b: (1, C) float32
    o_ref[...] = y.astype(o_ref.dtype)


def _layer_norm_channels_first(x, weight, bias, eps, spatial_tile=None):
    """LayerNorm over axis 1 of (B, C, *spatial) with per-channel affine."""
    b, c = x.shape[0], x.shape[1]
    s = int(math.prod(x.shape[2:])) if x.ndim > 2 else 1
    x3 = x.reshape(b, c, s)                              # contiguous reshape (free)
    itemsize = jnp.dtype(x.dtype).itemsize

    if spatial_tile is None:
        ts = (_TARGET_TILE_BYTES // max(1, c * itemsize)) // 128 * 128
        ts = max(128, ts)
    else:
        ts = spatial_tile
    if ts >= s:
        ts = s                                           # full spatial extent per batch

    w2 = weight.reshape(c, 1).astype(jnp.float32)
    b2 = bias.reshape(c, 1).astype(jnp.float32)

    grid = (b, pl.cdiv(s, ts))                           # tail block masked on writeback
    out = pl.pallas_call(
        functools.partial(_ln_channels_first_kernel, eps=eps),
        out_shape=jax.ShapeDtypeStruct((b, c, s), x.dtype),
        grid_spec=pltpu.PrefetchScalarGridSpec(
            num_scalar_prefetch=0,
            grid=grid,
            in_specs=[
                pl.BlockSpec((None, c, ts), lambda i, j: (i, 0, j)),
                pl.BlockSpec((c, 1), lambda i, j: (0, 0)),
                pl.BlockSpec((c, 1), lambda i, j: (0, 0)),
            ],
            out_specs=pl.BlockSpec((None, c, ts), lambda i, j: (i, 0, j)),
        ),
        compiler_params=pltpu.CompilerParams(
            dimension_semantics=("parallel", "parallel"),
            vmem_limit_bytes=_VMEM_LIMIT_BYTES),
    )(x3, w2, b2)
    return out.reshape(x.shape)


def _layer_norm_channels_last(x, weight, bias, eps, row_tile=None):
    """LayerNorm over the last axis of (..., C) with per-channel affine."""
    c = x.shape[-1]
    lead = x.shape[:-1]
    n = int(math.prod(lead)) if lead else 1
    x2 = x.reshape(n, c)
    itemsize = jnp.dtype(x.dtype).itemsize

    if row_tile is None:
        tm = (_TARGET_TILE_BYTES // max(1, c * itemsize)) // 8 * 8
        tm = max(8, min(tm, 4096))
    else:
        tm = row_tile
    if tm >= n:
        tm = n

    w2 = weight.reshape(1, c).astype(jnp.float32)
    b2 = bias.reshape(1, c).astype(jnp.float32)

    grid = (pl.cdiv(n, tm),)                             # tail block masked on writeback
    out = pl.pallas_call(
        functools.partial(_ln_rows_kernel, eps=eps),
        out_shape=jax.ShapeDtypeStruct((n, c), x.dtype),
        grid_spec=pltpu.PrefetchScalarGridSpec(
            num_scalar_prefetch=0,
            grid=grid,
            in_specs=[
                pl.BlockSpec((tm, c), lambda i: (i, 0)),
                pl.BlockSpec((1, c), lambda i: (0, 0)),
                pl.BlockSpec((1, c), lambda i: (0, 0)),
            ],
            out_specs=pl.BlockSpec((tm, c), lambda i: (i, 0)),
        ),
        compiler_params=pltpu.CompilerParams(
            dimension_semantics=("parallel",),
            vmem_limit_bytes=_VMEM_LIMIT_BYTES),
    )(x2, w2, b2)
    return out.reshape(x.shape)


def layer_norm(x, weight, bias, eps=1e-5, data_format="channels_first"):
    """Forward pass of medformer LayerNorm.

    channels_first: x is (B, C, *spatial); normalize over C, per-channel affine.
    channels_last : x is (..., C); normalize over the last dim (F.layer_norm).
    """
    if data_format not in ("channels_last", "channels_first"):
        raise NotImplementedError
    if data_format == "channels_last":
        return _layer_norm_channels_last(x, weight, bias, eps)
    return _layer_norm_channels_first(x, weight, bias, eps)


def _reference_channels_first(x, weight, bias, eps):
    u = jnp.mean(x, axis=1, keepdims=True)
    s = jnp.mean((x - u) ** 2, axis=1, keepdims=True)
    xn = (x - u) / jnp.sqrt(s + eps)
    shape = (1, x.shape[1]) + (1,) * (x.ndim - 2)
    return weight.reshape(shape) * xn + bias.reshape(shape)


def _reference_channels_last(x, weight, bias, eps):
    u = jnp.mean(x, axis=-1, keepdims=True)
    s = jnp.mean((x - u) ** 2, axis=-1, keepdims=True)
    xn = (x - u) / jnp.sqrt(s + eps)
    return weight * xn + bias


if __name__ == "__main__":
    key = jax.random.PRNGKey(0)
    k1, k2, k3, k4 = jax.random.split(key, 4)

    # channels_first (module's default use): 5-D NCDHW, small channel count.
    # Spatial size 4*8*9 = 288 is deliberately not a multiple of 128.
    B, C, D, H, W = 2, 8, 4, 8, 9
    x = jax.random.normal(k1, (B, C, D, H, W), dtype=jnp.float32)
    weight = jnp.ones((C,), jnp.float32) + 0.1 * jax.random.normal(k2, (C,), jnp.float32)
    bias = 0.1 * jax.random.normal(k3, (C,), jnp.float32)

    out = layer_norm(x, weight, bias, eps=1e-5, data_format="channels_first")
    out = jax.block_until_ready(out)
    ref = _reference_channels_first(x, weight, bias, 1e-5)
    assert out.shape == x.shape
    assert jnp.max(jnp.abs(out - ref)) < 1e-4, "channels_first mismatch vs reference"

    # Explicitly exercise the non-dividing spatial tile (masked tail) path.
    out_tail = _layer_norm_channels_first(x, weight, bias, 1e-5, spatial_tile=128)
    out_tail = jax.block_until_ready(out_tail)
    assert jnp.max(jnp.abs(out_tail - ref)) < 1e-4, "tail-masked path mismatch"

    # channels_last path (F.layer_norm over the last dim).
    x_cl = jax.random.normal(k4, (2, 5, 7, 32), dtype=jnp.float32)
    w_cl = jnp.ones((32,), jnp.float32)
    b_cl = jnp.zeros((32,), jnp.float32)
    out_cl = layer_norm(x_cl, w_cl, b_cl, eps=1e-5, data_format="channels_last")
    out_cl = jax.block_until_ready(out_cl)
    ref_cl = _reference_channels_last(x_cl, w_cl, b_cl, 1e-5)
    assert jnp.max(jnp.abs(out_cl - ref_cl)) < 1e-4, "channels_last mismatch vs reference"

    print("KERNEL_OK")
</pallas_src>

<mosaic_0001>
module attributes {stable_mosaic.version = 11 : i64} {
  func.func @_ln_channels_first_kernel(%arg0: i32, %arg1: i32, %arg2: memref<1x8x288xf32, #tpu.memory_space<vmem>>, %arg3: memref<8x1xf32, #tpu.memory_space<vmem>>, %arg4: memref<8x1xf32, #tpu.memory_space<vmem>>, %arg5: memref<1x8x288xf32, #tpu.memory_space<vmem>>) attributes {dimension_semantics = [#tpu.dimension_semantics<parallel>, #tpu.dimension_semantics<parallel>], iteration_bounds = array<i64: 2, 1>, scalar_prefetch = 0 : i64, scratch_operands = 0 : i64, tpu.core_type = #tpu.core_type<tc>, window_params = [{transform_indices = @transform_0, window_bounds = array<i64: 1, 8, 288>}, {pipeline_mode = #tpu.pipeline_mode<synchronous>, transform_indices = @transform_1, window_bounds = array<i64: 8, 1>}, {pipeline_mode = #tpu.pipeline_mode<synchronous>, transform_indices = @transform_2, window_bounds = array<i64: 8, 1>}, {transform_indices = @transform_3, window_bounds = array<i64: 1, 8, 288>}]} {
    %c0 = arith.constant 0 : index
    %c0_0 = arith.constant 0 : index
    %c0_1 = arith.constant 0 : index
    %0 = vector.load %arg2[%c0, %c0_0, %c0_1] : memref<1x8x288xf32, #tpu.memory_space<vmem>>, vector<1x8x288xf32>
    %1 = vector.shape_cast %0 : vector<1x8x288xf32> to vector<8x288xf32>
    %cst = arith.constant dense<0.000000e+00> : vector<288xf32>
    %2 = vector.multi_reduction <add>, %1, %cst [0] : vector<8x288xf32> to vector<288xf32>
    %3 = vector.shape_cast %2 : vector<288xf32> to vector<1x288xf32>
    %cst_2 = arith.constant 8.000000e+00 : f32
    %4 = vector.broadcast %cst_2 : f32 to vector<1x288xf32>
    %5 = arith.divf %3, %4 : vector<1x288xf32>
    %6 = vector.broadcast %5 : vector<1x288xf32> to vector<8x288xf32>
    %7 = arith.subf %1, %6 : vector<8x288xf32>
    %8 = arith.mulf %7, %7 : vector<8x288xf32>
    %cst_3 = arith.constant dense<0.000000e+00> : vector<288xf32>
    %9 = vector.multi_reduction <add>, %8, %cst_3 [0] : vector<8x288xf32> to vector<288xf32>
    %10 = vector.shape_cast %9 : vector<288xf32> to vector<1x288xf32>
    %cst_4 = arith.constant 8.000000e+00 : f32
    %11 = vector.broadcast %cst_4 : f32 to vector<1x288xf32>
    %12 = arith.divf %10, %11 : vector<1x288xf32>
    %cst_5 = arith.constant 9.99999974E-6 : f32
    %13 = vector.broadcast %cst_5 : f32 to vector<1x288xf32>
    %14 = arith.addf %12, %13 : vector<1x288xf32>
    %15 = math.rsqrt %14 : vector<1x288xf32>
    %16 = vector.broadcast %15 : vector<1x288xf32> to vector<8x288xf32>
    %17 = arith.mulf %7, %16 : vector<8x288xf32>
    %c0_6 = arith.constant 0 : index
    %c0_7 = arith.constant 0 : index
    %18 = vector.load %arg3[%c0_6, %c0_7] : memref<8x1xf32, #tpu.memory_space<vmem>>, vector<8x1xf32>
    %19 = vector.broadcast %18 : vector<8x1xf32> to vector<8x288xf32>
    %20 = arith.mulf %17, %19 : vector<8x288xf32>
    %c0_8 = arith.constant 0 : index
    %c0_9 = arith.constant 0 : index
    %21 = vector.load %arg4[%c0_8, %c0_9] : memref<8x1xf32, #tpu.memory_space<vmem>>, vector<8x1xf32>
    %22 = vector.broadcast %21 : vector<8x1xf32> to vector<8x288xf32>
    %23 = arith.addf %20, %22 : vector<8x288xf32>
    %c0_10 = arith.constant 0 : index
    %c0_11 = arith.constant 0 : index
    %c0_12 = arith.constant 0 : index
    %24 = vector.load %arg5[%c0_10, %c0_11, %c0_12] : memref<1x8x288xf32, #tpu.memory_space<vmem>>, vector<1x8x288xf32>
    %25 = vector.shape_cast %24 : vector<1x8x288xf32> to vector<8x288xf32>
    %26 = vector.shape_cast %23 : vector<8x288xf32> to vector<1x8x288xf32>
    tpu.vector_store %arg5[%c0_10, %c0_11, %c0_12], %26 {strides = array<i32>} : memref<1x8x288xf32, #tpu.memory_space<vmem>>, vector<1x8x288xf32>,
    return
  }
  func.func @transform_0(%arg0: i32, %arg1: i32) -> (i32, i32, i32) {
    %c0_i32 = arith.constant 0 : i32
    %c0_i32_0 = arith.constant 0 : i32
    return %arg0, %c0_i32, %arg1 : i32, i32, i32
  }
  func.func @transform_1(%arg0: i32, %arg1: i32) -> (i32, i32) {
    %c0_i32 = arith.constant 0 : i32
    %c0_i32_0 = arith.constant 0 : i32
    %c0_i32_1 = arith.constant 0 : i32
    return %c0_i32, %c0_i32_0 : i32, i32
  }
  func.func @transform_2(%arg0: i32, %arg1: i32) -> (i32, i32) {
    %c0_i32 = arith.constant 0 : i32
    %c0_i32_0 = arith.constant 0 : i32
    %c0_i32_1 = arith.constant 0 : i32
    return %c0_i32, %c0_i32_0 : i32, i32
  }
  func.func @transform_3(%arg0: i32, %arg1: i32) -> (i32, i32, i32) {
    %c0_i32 = arith.constant 0 : i32
    %c0_i32_0 = arith.constant 0 : i32
    return %arg0, %c0_i32, %arg1 : i32, i32, i32
  }
}

</mosaic_0001>

<bundles_post_ra>
// kernel: tpu_custom_call.1
= control target key start
LH: loop header
LB: loop body
LE: loop exit
PB: predicated region body
PF: predicated region fallthrough
CT: control target
= control target key end

     0   :  { %8 = vsyncpa [#allocation3], 0  ;;  %s800_s0 = inlined_call_operand.hbm [shape: f32[2,8,288], index: 0, kind: input, shape index: {}]   ;;  %s801_s1 = inlined_call_operand.vmem [shape: f32[8,1], index: 1, kind: input, shape index: {}]   ;;  %s802_s2 = inlined_call_operand.vmem [shape: f32[8,1], index: 2, kind: input, shape index: {}]   ;;  %s803_s3 = inlined_call_operand.hbm [shape: f32[2,8,288], index: 3, kind: output, shape index: {}]  }
   0x1   :  { %10 = vsyncpa [#allocation3 + $0x1], 0 }
   0x2   :  { %11 = vsyncpa [#allocation4], 0 }
   0x3   :  { %13 = vsyncpa [#allocation4 + $0x1], 0  ;;  %s652_s12 = smov 0   ;;  %s654_s13 = smov 0  }
   0x4   :  { %s656_s14 = smov 0   ;;  %s658_s15 = smov 0  }
   0x5   :  { %s660_s16 = smov 0   ;;  %s662_s17 = smov 0  }
   0x6 LB: > { %s430_s18 = sadd.s32 4294967295, %s628_s17   ;;  %s431_s19 = sadd.s32 4294967294, %s628_s17   ;;  %s628_s17 = sphi %s662_s17, %s19_s17   ;;  %s624_s16 = sphi %s660_s16, %s812_s16   ;;  %s620_s15 = sphi %s658_s15, %s811_s15   ;;  %s616_s14 = sphi %s656_s14, %s810_s14   ;;  %s612_s13 = sphi %s654_s13, %s809_s13   ;;  %s608_s12 = sphi %s652_s12, %s808_s12  }
   0x7   : > { %s31_s20 = sadd.s32 1, %s624_s16  ;;  %s40_s21 = sadd.s32 1, %s616_s14 }
   0x8   : > { %p33_p0 = scmp.ge.s32.totalorder %s31_s20, 2  ;;  %p47_p1 = scmp.ne.s32.totalorder %s616_s14, %s612_s13 }
   0x9   : > { %p48_p2 = scmp.eq.s32.totalorder %s628_s17, 0  ;;  %p53_p3 = scmp.ne.s32.totalorder %s612_s13, %s608_s12 }
   0xa   : > { %s814_s20 = smov (%p33_p0, %s31_s20), 0  ;;  %p54_p5 = scmp.eq.s32.totalorder %s430_s18, 0 }
   0xb   : > { %p693_p4 = por %p48_p2, %p47_p1  ;;  %s35_s23 = ssub.s32 %s624_s16, %s814_s20 }
   0xc   : > { %p121_p6 = scmp.eq.s32.totalorder %s430_s18, 1  ;;  %p38_p7 = scmp.eq.s32.totalorder %s35_s23, 0 }
   0xd   : > { %p699_p8 = por %p54_p5, %p53_p3  ;;  %p127_p10 = scmp.eq.s32.totalorder %s431_s19, 1 }
   0xe   : > { %p703_p9 = por %p121_p6, %p47_p1  ;;  %p433_p12 = scmp.ge.s32.totalorder %s628_s17, 2 }
   0xf   : > { %s708_s26 = scalar_select %p38_p7, %s616_s14, %s40_s21  }
  0x10   : > { %p710_p11 = por %p127_p10, %p53_p3  ;;  %p455_p13 = scmp.lt.s32.totalorder %s628_s17, 2 }
  0x11   : > { %s153_s28 = sand.u32 1, %s616_s14   ;;  %s440_s30 = smul.u32 24, %s624_s16 }
  0x12   : > { %s439_s29 = smul.u32 24, %s153_s28  ;;  %p448_p0 = pnand %p455_p13, %p693_p4 }
  0x13   : > { %p435_p2 = scmp.ge.s32.totalorder %s628_s17, 1  ;;  %s164_s6 = scalar_lea.hbm %s800_s0, %s440_s30 }
  0x14   : > { %s157_s7 = scalar_lea.vmem [#allocation2], %s439_s29  ;;  %s166_s9 = sshll.u32 %s164_s6, 4  ;;  %s167_s9 = int_to_ptr.hbm [resolvable:$true] %s166_s9 }
  0x15   : > { %s168_s8 = sshll.u32 %s157_s7, 4  ;;  %s154_s10 = scalar_lea.sflag [#allocation3], %s153_s28  ;;  %s169_s8 = int_to_ptr.vmem [resolvable:$true] %s168_s8 }
  0x16   : > { %450 = dma.hbm_to_vmem [thread:$0]  (!%p448_p0), %s167_s9, 384, %s169_s8, %s154_s10  }
  0x17   : > { %p173_p1 = scmp.lt.s32.totalorder %s628_s17, 3 }
  0x19   : > { %p174_p3 = pnand %p435_p2, %p173_p1 }
  0x1a   : > { %s726_s11 = sand.u32 (!%p174_p3), 1, %s612_s13  }
  0x1b   : > { %177 = sbr.rel (%p174_p3) target bundleno = 165 (0xa5), region = 32  ;;  %s180_s19 = scalar_lea.sflag (!%p174_p3), [#allocation3], %s726_s11 }
  0x1c   : > { %s441_s18 = smul.u32 (!%p174_p3), 24, %s726_s11 }
  0x1e   : > { %s183_s21 = scalar_lea.vmem (!%p174_p3), [#allocation2], %s441_s18 }
  0x20   : > { %599 = dma.done.wait (%p699_p8), %s180_s19, 384  }
  0x21   : > { %601 = vsyncadd (%p699_p8), %s180_s19, 4294966912  ;;  %v630_v0 = vmov 0   ;;  %v306_v1 = vld [vmem:[%s801_s1] sm:$0xff]  ;;  %v631_v3 = vmov 8.0   ;;  %vm224_vm0 = vcmask 261120   ;;  %v211_v7 = vld [vmem:[%s183_s21 + $0x10] sm:$0xff] }
  0x22   : > { %507 = vset.pattern.permute.xlu0 %v630_v0  ;;  %v315_v2 = vld [vmem:[%s802_s2] sm:$0xff]  ;;  %508 = vrcp.f32 %v631_v3  ;;  %v225_v8 = vsel %vm224_vm0, %v211_v7, 0.0  ;;  %s442_s24 = smul.u32 24, %s620_s15  ;;  %s206_s6 = scalar_lea.vmem [#allocation5], %s441_s18 }
  0x23   : > { %309 = vperm.xlu0 %507, %v306_v1   ;;  %v209_v9 = vld [vmem:[%s183_s21] sm:$0xff]  ;;  %v210_v10 = vld [vmem:[%s183_s21 + $0x8] sm:$0xff]  ;;  %v226_v11 = vrot.slane %v225_v8, 4  ;;  %s343_s7 = sshll.u32 %s206_s6, 4  ;;  %s328_s8 = scalar_lea.sflag [#allocation4], %s726_s11  ;;  %s344_s7 = int_to_ptr.vmem [resolvable:$true] %s343_s7 }
  0x24   : > { %v212_v13 = vrot.slane %v209_v9, 4  ;;  %v218_v14 = vrot.slane %v210_v10, 4  ;;  %s341_s5 = scalar_lea.hbm %s803_s3, %s442_s24  ;;  %s566_s21 = scalar_lea.hbm %s803_s3, 48 }
  0x25   : > { %v227_v15 = vadd.f32 %v226_v11, %v225_v8  ;;  %s345_s15 = sshll.u32 %s341_s5, 4  ;;  %s346_s15 = int_to_ptr.hbm [resolvable:$true] %s345_s15 }
  0x26   : > { %v213_v16 = vadd.f32 %v212_v13, %v209_v9  ;;  %v219_v17 = vadd.f32 %v218_v14, %v210_v10  ;;  %s560_s9 = sshra.s32 %s346_s15, 4  ;;  %s561_s9 = int_to_ptr.hbm [resolvable:$true] %s560_s9 }
  0x27   : > { %v228_v18 = vrot.slane %v227_v15, 2  ;;  %s562_s10 = scalar_lea.hbm %s561_s9, 24  ;;  %p567_p7 = scmp.lt.s32.totalorder %s561_s9, %s803_s3 }
  0x28   : > { %v509_v4 = vpop.eup %508  ;;  %v214_v20 = vrot.slane %v213_v16, 2  ;;  %v220_v21 = vrot.slane %v219_v17, 2  ;;  %p563_p4 = scmp.ne.s32.totalorder %s561_s9, %s562_s10  ;;  %p568_p8 = scmp.lt.s32.totalorder %s566_s21, %s562_s10 }
  0x29   : > { %v233_v5 = vmul.f32 8.0, %v509_v4  ;;  %vm237_vm1 = vweird.f32 %v509_v4  ;;  %v229_v22 = vadd.f32 %v228_v18, %v227_v15 }
  0x2a   : > { %v215_v23 = vadd.f32 %v214_v20, %v213_v16  ;;  %v221_v24 = vadd.f32 %v220_v21, %v219_v17  ;;  %p564_p5 = pnand %p563_p4, %p703_p9  ;;  %p569_p10 = por %p568_p8, %p567_p7 }
  0x2b   : > { %318 = vperm.xlu0 %507, %v315_v2   ;;  %v234_v6 = vsub.f32 1.0, %v233_v5  ;;  %v230_v25 = vrot.slane %v229_v22, 1 }
  0x2c   : > { %v216_v27 = vrot.slane %v215_v23, 1  ;;  %v222_v28 = vrot.slane %v221_v24, 1  ;;  %p565_p6 = pneg %p564_p5 }
  0x2d   : > { %v235_v12 = vmul.f32 %v509_v4, %v234_v6  ;;  %v231_v29 = vadd.f32 %v230_v25, %v229_v22 }
  0x2e   : > { %v217_v30 = vadd.f32 %v216_v27, %v215_v23  ;;  %v223_v31 = vadd.f32 %v222_v28, %v221_v24  ;;  %p570_p13 = pnand %p569_p10, %p565_p6 }
  0x2f   : > { %v236_v19 = vadd.f32 %v509_v4, %v235_v12 }
  0x31   : > { %v238_v26 = vsel %vm237_vm1, %v509_v4, %v236_v19 }
  0x32   : > { %v241_v32 = vmul.f32 %v238_v26, %v231_v29  ;;  %v239_v33 = vmul.f32 %v238_v26, %v217_v30  ;;  %v240_v34 = vmul.f32 %v238_v26, %v223_v31 }
  0x34   : > { %v743_v35 = vsub.f32 %v211_v7, %v241_v32  ;;  %v745_v36 = vsub.f32 %v209_v9, %v239_v33  ;;  %v747_v37 = vsub.f32 %v210_v10, %v240_v34 }
  0x36   : > { %v247_v38 = vmul.f32 %v743_v35, %v743_v35  ;;  %v245_v39 = vmul.f32 %v745_v36, %v745_v36  ;;  %v246_v40 = vmul.f32 %v747_v37, %v747_v37 }
  0x38   : > { %v260_v41 = vsel %vm224_vm0, %v247_v38, 0.0  ;;  %v248_v42 = vrot.slane %v245_v39, 4  ;;  %v254_v43 = vrot.slane %v246_v40, 4 }
  0x39   : > { %v261_v44 = vrot.slane %v260_v41, 4 }
  0x3a   : > { %v249_v45 = vadd.f32 %v248_v42, %v245_v39  ;;  %v255_v46 = vadd.f32 %v254_v43, %v246_v40 }
  0x3b   : > { %v262_v47 = vadd.f32 %v261_v44, %v260_v41 }
  0x3c   : > { %v250_v48 = vrot.slane %v249_v45, 2  ;;  %v256_v49 = vrot.slane %v255_v46, 2 }
  0x3d   : > { %v263_v50 = vrot.slane %v262_v47, 2 }
  0x3e   : > { %v251_v51 = vadd.f32 %v250_v48, %v249_v45  ;;  %v257_v52 = vadd.f32 %v256_v49, %v255_v46 }
  0x3f   : > { %v264_v53 = vadd.f32 %v263_v50, %v262_v47 }
  0x40   : > { %v252_v54 = vrot.slane %v251_v51, 1  ;;  %v258_v55 = vrot.slane %v257_v52, 1 }
  0x41   : > { %v265_v56 = vrot.slane %v264_v53, 1 }
  0x42   : > { %v253_v57 = vadd.f32 %v252_v54, %v251_v51  ;;  %v259_v58 = vadd.f32 %v258_v55, %v257_v52 }
  0x43   : > { %v266_v59 = vadd.f32 %v265_v56, %v264_v53 }
  0x44   : > { %v267_v60 = vmul.f32 %v253_v57, %v238_v26  ;;  %v268_v61 = vmul.f32 %v259_v58, %v238_v26 }
  0x45   : > { %v269_v62 = vmul.f32 %v266_v59, %v238_v26 }
  0x46   : > { %v270_v63 = vadd.f32 1e-05, %v267_v60  ;;  %v271_v0 = vadd.f32 1e-05, %v268_v61 }
  0x47   : > { %v272_v1 = vadd.f32 1e-05, %v269_v62 }
  0x48   : > { %510 = vrsqrt.f32 %v270_v63  ;;  %vm279_vm2 = vweird.f32 %v270_v63  ;;  %vm289_vm4 = vweird.f32 %v271_v0 }
  0x49   : > { %512 = vrsqrt.f32 %v271_v0  ;;  %vm299_vm6 = vweird.f32 %v272_v1 }
  0x4a   : > { %514 = vrsqrt.f32 %v272_v1 }
  0x4e   : > { %v511_v2 = vpop.eup %510 }
  0x4f   : > { %v513_v3 = vpop.eup %512  ;;  %v274_v5 = vmul.f32 %v511_v2, %v270_v63  ;;  %vm280_vm3 = vweird.f32 %v511_v2 }
  0x50   : > { %v515_v4 = vpop.eup %514  ;;  %v284_v6 = vmul.f32 %v513_v3, %v271_v0  ;;  %vm290_vm5 = vweird.f32 %v513_v3  ;;  %vm281_vm8 = vmor %vm279_vm2, %vm280_vm3 }
  0x51   : > { %v294_v7 = vmul.f32 %v515_v4, %v272_v1  ;;  %v275_v8 = vmul.f32 %v511_v2, %v274_v5  ;;  %vm300_vm7 = vweird.f32 %v515_v4  ;;  %vm291_vm9 = vmor %vm289_vm4, %vm290_vm5 }
  0x52   : > { %v285_v9 = vmul.f32 %v513_v3, %v284_v6  ;;  %vm301_vm10 = vmor %vm299_vm6, %vm300_vm7 }
  0x53   : > { %v295_v10 = vmul.f32 %v515_v4, %v294_v7  ;;  %v276_v11 = vmul.f32 0.5, %v275_v8 }
  0x54   : > { %v286_v12 = vmul.f32 0.5, %v285_v9 }
  0x55   : > { %v296_v13 = vmul.f32 0.5, %v295_v10  ;;  %v277_v14 = vsub.f32 1.5, %v276_v11 }
  0x56   : > { %v287_v15 = vsub.f32 1.5, %v286_v12 }
  0x57   : > { %v297_v16 = vsub.f32 1.5, %v296_v13  ;;  %v278_v17 = vmul.f32 %v511_v2, %v277_v14 }
  0x58   : > { %v288_v18 = vmul.f32 %v513_v3, %v287_v15 }
  0x59   : > { %v298_v19 = vmul.f32 %v515_v4, %v297_v16  ;;  %v282_v21 = vsel %vm281_vm8, %v511_v2, %v278_v17 }
  0x5a   : > { %v292_v22 = vsel %vm291_vm9, %v513_v3, %v288_v18  ;;  %v303_v24 = vmul.f32 %v282_v21, %v745_v36 }
  0x5b   : > { %v302_v23 = vsel %vm301_vm10, %v515_v4, %v298_v19  ;;  %v304_v25 = vmul.f32 %v292_v22, %v747_v37 }
  0x5c   : > { %v305_v26 = vmul.f32 %v302_v23, %v743_v35 }
  0x95   : > { %v310_v20 = vpop.permute.xlu0 %309 }
  0x96   : > { %v312_v27 = vmul.f32 %v310_v20, %v303_v24  ;;  %v313_v28 = vmul.f32 %v310_v20, %v304_v25  ;;  %v314_v29 = vmul.f32 %v310_v20, %v305_v26 }
  0x9d   : > { %v319_v30 = vpop.permute.xlu0 %318 }
  0x9e   : > { %v321_v31 = vadd.f32 %v319_v30, %v312_v27  ;;  %v322_v32 = vadd.f32 %v319_v30, %v313_v28  ;;  %v323_v33 = vadd.f32 %v319_v30, %v314_v29 }
  0xa0   : > { %324 = vst [vmem:[%s206_s6] sm:$0xff] %v321_v31 }
  0xa1   : > { %325 = vst [vmem:[%s206_s6 + $0x8] sm:$0xff] %v322_v32 }
  0xa2   : > { %326 = vst.msk [vmem:[%s206_s6 + $0x10] sm:$0xff] %vm224_vm0, %v323_v33 }
  0xa3   : > { %573 = shalt.err (!%p570_p13)
}
  0xa4   : > { %445 = dma.vmem_to_hbm [thread:$0]  (%p703_p9), %s344_s7, 384, %s346_s15, %s328_s8  }
  0xa5 PF: > { %s357_s11 = sand.u32 1, %s608_s12   ;;  %p452_p0 = pnand %p433_p12, %p710_p11 }
  0xa6   : > { %s358_s28 = scalar_lea.sflag [#allocation4], %s357_s11 }
  0xa7   : > { %p453_p2 = pneg %p452_p0 }
  0xa9   : > { %603 = dma.done.wait (%p453_p2), %s358_s28, 384  }
  0xaa   : > { %605 = vsyncadd (%p453_p2), %s358_s28, 4294966912  ;;  %s19_s17 = sadd.s32 1, %s628_s17   ;;  %s808_s12 = smov %s612_s13 }
  0xab   : > { %p16_p1 = scmp.ge.s32.totalorder %s19_s17, 4   ;;  %s809_s13 = smov %s616_s14 }
  0xac   : > { %s810_s14 = smov %s708_s26  ;;  %s811_s15 = smov %s624_s16 }
  0xad   : > { %s812_s16 = smov %s814_s20  ;;  %18 = sbr.rel (!%p16_p1) target bundleno = 6 (0x6), region = 77 }
  0xb2   :  { %364 = vsyncpa [#allocation3], 1 }
  0xb3   :  { %366 = vsyncpa [#allocation3 + $0x1], 1 }
  0xb4   :  { %367 = vsyncpa [#allocation4], 1 }
  0xb5   :  { %369 = vsyncpa [#allocation4 + $0x1], 1 }

</bundles_post_ra>
